<compile_context>
chip_gen: v5e
topology: v5e:2x2
jax: 0.10.0
libtpu: 0.0.40
codegen_flags: <defaults>
</compile_context>

<pallas_src>
import functools
import math

import jax
import jax.numpy as jnp
import numpy as np
from jax.experimental import pallas as pl
from jax.experimental.pallas import tpu as pltpu

HIDDEN = 32   # hidden channels of the reduced denoiser
KSIZE = 3     # conv kernel size (padding=1)
TFEAT = 16    # time-embedding fourier feature width


# ----------------------------------------------------------------------------
# Fused kernel: noisify -> conv1(k=3) -> +temb -> SiLU -> conv2(k=3) -> MSE
# ----------------------------------------------------------------------------
def _fused_loss_kernel(alpha_ref, beta_ref, phase_ref, noise_ref, mag_ref,
                       temb_ref, w1_ref, b1_ref, w2_ref, b2_ref, loss_ref,
                       *, inv_pi, inv_n, t_per_batch):
    C, BT = phase_ref.shape

    # Per-batch time-boundary masks: columns of the lane-packed (., B*T) slab
    # where the k=3 halo would otherwise read the neighbouring batch (or wrap).
    col = jax.lax.broadcasted_iota(jnp.int32, (1, BT), 1)
    tmod = col % t_per_batch
    is_first = tmod == 0                      # t == 0   -> zero the "prev" tap
    is_last = tmod == (t_per_batch - 1)       # t == T-1 -> zero the "next" tap

    def shift_stack(v):
        # im2col for a k=3, padding=1 conv on a lane-packed (rows, B*T) slab:
        # rows become [v[t-1], v[t], v[t+1]] with zeroed per-batch boundaries.
        rows = v.shape[0]
        zero_col = jnp.zeros((rows, 1), v.dtype)
        prev = jnp.concatenate([zero_col, v[:, :BT - 1]], axis=1)
        nxt = jnp.concatenate([v[:, 1:], zero_col], axis=1)
        prev = jnp.where(is_first, 0.0, prev)
        nxt = jnp.where(is_last, 0.0, nxt)
        return jnp.concatenate([prev, v, nxt], axis=0)

    a = alpha_ref[...]                         # (1, BT)
    be = beta_ref[...]                         # (1, BT)
    x = phase_ref[...] * inv_pi                # (C, BT): phase / pi
    n = noise_ref[...]

    x_noisy = a * x + be * n
    v_target = a * n - be * x

    # context channel injection + im2col -> single MXU matmul for conv1
    xin = jnp.concatenate([x_noisy, mag_ref[...]], axis=0)       # (2C, BT)
    xs = shift_stack(xin).astype(jnp.bfloat16)                   # (K*2C, BT)
    h = jnp.dot(w1_ref[...], xs, preferred_element_type=jnp.float32)  # (H, BT)
    h = h + b1_ref[...] + temb_ref[...]
    h = h * jax.nn.sigmoid(h)                                    # SiLU (EUP)

    # im2col for conv2 directly from h (no padded-scratch round trip)
    hs = shift_stack(h).astype(jnp.bfloat16)                     # (K*H, BT)
    v_pred = jnp.dot(w2_ref[...], hs, preferred_element_type=jnp.float32)
    v_pred = v_pred + b2_ref[...]                                # (C, BT)

    d = v_pred - v_target
    loss_ref[0, 0] = jnp.sum(d * d) * inv_n    # static 1/N, no in-kernel divide


# ----------------------------------------------------------------------------
# Glue: time embedding, parameter init, forward wrapper, pure-JAX reference
# ----------------------------------------------------------------------------
def time_embedding(sigmas, params):
    half = TFEAT // 2
    freqs = (2.0 ** jnp.arange(half, dtype=jnp.float32)) * jnp.pi
    ang = sigmas[:, None] * freqs[None, :]
    feats = jnp.concatenate([jnp.cos(ang), jnp.sin(ang)], axis=-1)  # (B, TFEAT)
    return feats @ params["wt"].T + params["bt"]                    # (B, H)


def init_params(key, c_spec, hidden=HIDDEN):
    ks = jax.random.split(key, 6)
    cin = 2 * c_spec
    s1 = 1.0 / math.sqrt(cin * KSIZE)
    s2 = 1.0 / math.sqrt(hidden * KSIZE)
    st = 1.0 / math.sqrt(TFEAT)
    return {
        "w1": jax.random.normal(ks[0], (KSIZE, hidden, cin), jnp.float32) * s1,
        "b1": jax.random.normal(ks[1], (hidden, 1), jnp.float32) * s1,
        "w2": jax.random.normal(ks[2], (KSIZE, c_spec, hidden), jnp.float32) * s2,
        "b2": jax.random.normal(ks[3], (c_spec, 1), jnp.float32) * s2,
        "wt": jax.random.normal(ks[4], (hidden, TFEAT), jnp.float32) * st,
        "bt": jax.random.normal(ks[5], (hidden,), jnp.float32) * st,
    }


def diffusion_vocoder_forward(magnitude, phase, params, sigmas, noise):
    """Pallas forward: returns the scalar v-diffusion training loss."""
    B, C_in, F, T = magnitude.shape
    C = C_in * F                                   # (c f) channels
    BT = B * T

    # Layout plumbing only (no compute hoisted): present lane-dense (C, B*T)
    # slabs so the in-kernel convs are single wide MXU dots.
    def to_lane_major(v):                          # (B,C_in,F,T) -> (C, B*T)
        return v.reshape(B, C, T).transpose(1, 0, 2).reshape(C, BT)

    mag = to_lane_major(magnitude).astype(jnp.float32)
    ph = to_lane_major(phase).astype(jnp.float32)   # /pi applied in-kernel
    nz = to_lane_major(noise).astype(jnp.float32)

    alpha = jnp.cos(sigmas * (jnp.pi / 2)).astype(jnp.float32)    # (B,)
    beta = jnp.sin(sigmas * (jnp.pi / 2)).astype(jnp.float32)     # (B,)
    alpha_bt = jnp.repeat(alpha, T).reshape(1, BT)
    beta_bt = jnp.repeat(beta, T).reshape(1, BT)

    temb = time_embedding(sigmas, params).astype(jnp.float32)     # (B, H)
    temb_bt = jnp.broadcast_to(temb.T[:, :, None], (HIDDEN, B, T)).reshape(HIDDEN, BT)

    # Flatten conv weights for the in-kernel im2col single-dot form and cast
    # the matmul operands to bf16 (f32 accumulation inside the kernel).
    w1f = (params["w1"].transpose(1, 0, 2)
           .reshape(HIDDEN, KSIZE * 2 * C).astype(jnp.bfloat16))   # (H, K*2C)
    w2f = (params["w2"].transpose(1, 0, 2)
           .reshape(C, KSIZE * HIDDEN).astype(jnp.bfloat16))       # (C, K*H)

    kernel = functools.partial(
        _fused_loss_kernel,
        inv_pi=float(1.0 / math.pi),
        inv_n=float(1.0 / (B * C * T)),
        t_per_batch=T,
    )

    vmem = pl.BlockSpec(memory_space=pltpu.MemorySpace.VMEM)
    smem = pl.BlockSpec(memory_space=pltpu.MemorySpace.SMEM)

    # TODO(synk): at realistic vocoder lengths (T ~ 1e4-1e6), tile the B*T lane
    #             axis with a grid (tile a multiple of 128, 1-sample halo kept
    #             in-kernel) and accumulate the loss across tiles so the working
    #             set fits v7x's 64 MiB VMEM.
    loss = pl.pallas_call(
        kernel,
        in_specs=[vmem] * 10,
        out_specs=smem,
        out_shape=jax.ShapeDtypeStruct((1, 1), jnp.float32),
    )(alpha_bt, beta_bt, ph, nz, mag, temb_bt, w1f, params["b1"], w2f,
      params["b2"])
    return loss[0, 0]


def reference_forward(magnitude, phase, params, sigmas, noise):
    """Pure-JAX reference with identical numerics (bf16 matmul operands, f32 acc)."""
    B, C_in, F, T = magnitude.shape
    C = C_in * F
    mag = magnitude.reshape(B, C, T)
    x = phase.reshape(B, C, T) / jnp.pi
    n = noise.reshape(B, C, T)
    a = jnp.cos(sigmas * (jnp.pi / 2))[:, None, None]
    be = jnp.sin(sigmas * (jnp.pi / 2))[:, None, None]
    x_noisy = a * x + be * n
    v_target = a * n - be * x
    temb = time_embedding(sigmas, params)

    xin = jnp.concatenate([x_noisy, mag], axis=1)
    xpad = jnp.pad(xin, ((0, 0), (0, 0), (1, 1))).astype(jnp.bfloat16)
    w1 = params["w1"].astype(jnp.bfloat16)
    w2 = params["w2"].astype(jnp.bfloat16)
    h = sum(jnp.einsum("hc,bct->bht", w1[k], xpad[:, :, k:k + T],
                       preferred_element_type=jnp.float32)
            for k in range(KSIZE))
    h = h + params["b1"][None] + temb[:, :, None]
    h = h * jax.nn.sigmoid(h)
    hpad = jnp.pad(h, ((0, 0), (0, 0), (1, 1))).astype(jnp.bfloat16)
    out = sum(jnp.einsum("oh,bht->bot", w2[k], hpad[:, :, k:k + T],
                         preferred_element_type=jnp.float32)
              for k in range(KSIZE))
    v_pred = out + params["b2"][None]
    return jnp.mean((v_pred - v_target) ** 2)


if __name__ == "__main__":
    key = jax.random.PRNGKey(0)
    k_mag, k_phase, k_sig, k_noise, k_par = jax.random.split(key, 5)

    B, C_in, num_fft, T = 2, 1, 16, 16
    F = num_fft // 2 + 1                 # frequency_channels = 9
    c_spec = C_in * F                    # spectrogram_channels = 9

    magnitude = jax.random.uniform(k_mag, (B, C_in, F, T), jnp.float32)
    phase = jax.random.uniform(k_phase, (B, C_in, F, T), jnp.float32,
                               minval=-math.pi, maxval=math.pi)
    sigmas = jax.random.uniform(k_sig, (B,), jnp.float32)
    noise = jax.random.normal(k_noise, (B, C_in, F, T), jnp.float32)
    params = init_params(k_par, c_spec)

    loss = jax.block_until_ready(
        diffusion_vocoder_forward(magnitude, phase, params, sigmas, noise))
    ref = reference_forward(magnitude, phase, params, sigmas, noise)
    np.testing.assert_allclose(np.asarray(loss), np.asarray(ref),
                               rtol=1e-4, atol=1e-5)
    print("KERNEL_OK")
</pallas_src>

<mosaic_0001>
module attributes {stable_mosaic.version = 11 : i64} {
  func.func @_fused_loss_kernel(%arg0: memref<1x32xf32, #tpu.memory_space<vmem>>, %arg1: memref<1x32xf32, #tpu.memory_space<vmem>>, %arg2: memref<9x32xf32, #tpu.memory_space<vmem>>, %arg3: memref<9x32xf32, #tpu.memory_space<vmem>>, %arg4: memref<9x32xf32, #tpu.memory_space<vmem>>, %arg5: memref<32x32xf32, #tpu.memory_space<vmem>>, %arg6: memref<32x54xbf16, #tpu.memory_space<vmem>>, %arg7: memref<32x1xf32, #tpu.memory_space<vmem>>, %arg8: memref<9x96xbf16, #tpu.memory_space<vmem>>, %arg9: memref<9x1xf32, #tpu.memory_space<vmem>>, %arg10: memref<1x1xf32, #tpu.memory_space<smem>>) attributes {dimension_semantics = [], scalar_prefetch = 0 : i64, scratch_operands = 0 : i64, tpu.core_type = #tpu.core_type<tc>} {
    %0 = tpu.iota {dimensions = array<i32: 1>} : vector<1x32xi32>
    %c16_i32 = arith.constant 16 : i32
    %c0_i32 = arith.constant 0 : i32
    %1 = arith.cmpi eq, %c16_i32, %c0_i32 : i32
    %c1_i32 = arith.constant 1 : i32
    %2 = arith.select %1, %c1_i32, %c16_i32 : i32
    %3 = vector.broadcast %2 : i32 to vector<1x32xi32>
    %4 = arith.remsi %0, %3 : vector<1x32xi32>
    %c0_i32_0 = arith.constant 0 : i32
    %5 = vector.broadcast %c0_i32_0 : i32 to vector<1x32xi32>
    %6 = arith.cmpi ne, %4, %5 : vector<1x32xi32>
    %c0_i32_1 = arith.constant 0 : i32
    %7 = vector.broadcast %c0_i32_1 : i32 to vector<1x32xi32>
    %8 = arith.cmpi slt, %4, %7 : vector<1x32xi32>
    %c0_i32_2 = arith.constant 0 : i32
    %9 = arith.cmpi slt, %2, %c0_i32_2 : i32
    %10 = vector.broadcast %9 : i1 to vector<1x32xi1>
    %11 = vector.broadcast %10 : vector<1x32xi1> to vector<1x32xi1>
    %12 = arith.xori %8, %11 : vector<1x32xi1>
    %13 = arith.andi %12, %6 : vector<1x32xi1>
    %14 = vector.broadcast %2 : i32 to vector<1x32xi32>
    %15 = arith.addi %4, %14 : vector<1x32xi32>
    %16 = arith.select %13, %15, %4 : vector<1x32xi1>, vector<1x32xi32>
    %c0_i32_3 = arith.constant 0 : i32
    %17 = vector.broadcast %c0_i32_3 : i32 to vector<1x32xi32>
    %18 = arith.cmpi eq, %16, %17 : vector<1x32xi32>
    %c15_i32 = arith.constant 15 : i32
    %19 = vector.broadcast %c15_i32 : i32 to vector<1x32xi32>
    %20 = arith.cmpi eq, %16, %19 : vector<1x32xi32>
    %c0 = arith.constant 0 : index
    %c0_4 = arith.constant 0 : index
    %21 = vector.load %arg0[%c0, %c0_4] : memref<1x32xf32, #tpu.memory_space<vmem>>, vector<1x32xf32>
    %c0_5 = arith.constant 0 : index
    %c0_6 = arith.constant 0 : index
    %22 = vector.load %arg1[%c0_5, %c0_6] : memref<1x32xf32, #tpu.memory_space<vmem>>, vector<1x32xf32>
    %c0_7 = arith.constant 0 : index
    %c0_8 = arith.constant 0 : index
    %23 = vector.load %arg2[%c0_7, %c0_8] : memref<9x32xf32, #tpu.memory_space<vmem>>, vector<9x32xf32>
    %cst = arith.constant 0.318309873 : f32
    %24 = vector.broadcast %cst : f32 to vector<9x32xf32>
    %25 = arith.mulf %23, %24 : vector<9x32xf32>
    %c0_9 = arith.constant 0 : index
    %c0_10 = arith.constant 0 : index
    %26 = vector.load %arg3[%c0_9, %c0_10] : memref<9x32xf32, #tpu.memory_space<vmem>>, vector<9x32xf32>
    %27 = vector.broadcast %21 : vector<1x32xf32> to vector<9x32xf32>
    %28 = arith.mulf %27, %25 : vector<9x32xf32>
    %29 = vector.broadcast %22 : vector<1x32xf32> to vector<9x32xf32>
    %30 = arith.mulf %29, %26 : vector<9x32xf32>
    %31 = arith.addf %28, %30 : vector<9x32xf32>
    %32 = vector.broadcast %21 : vector<1x32xf32> to vector<9x32xf32>
    %33 = arith.mulf %32, %26 : vector<9x32xf32>
    %34 = vector.broadcast %22 : vector<1x32xf32> to vector<9x32xf32>
    %35 = arith.mulf %34, %25 : vector<9x32xf32>
    %36 = arith.subf %33, %35 : vector<9x32xf32>
    %c0_11 = arith.constant 0 : index
    %c0_12 = arith.constant 0 : index
    %37 = vector.load %arg4[%c0_11, %c0_12] : memref<9x32xf32, #tpu.memory_space<vmem>>, vector<9x32xf32>
    %38 = tpu.concatenate %31, %37 in 0 : vector<9x32xf32>, vector<9x32xf32> -> vector<18x32xf32>
    %cst_13 = arith.constant 0.000000e+00 : f32
    %39 = vector.broadcast %cst_13 : f32 to vector<18x1xf32>
    %40 = vector.extract_strided_slice %38 {offsets = [0, 0], sizes = [18, 31], strides = [1, 1]} : vector<18x32xf32> to vector<18x31xf32>
    %41 = tpu.concatenate %39, %40 in 1 : vector<18x1xf32>, vector<18x31xf32> -> vector<18x32xf32>
    %42 = vector.extract_strided_slice %38 {offsets = [0, 1], sizes = [18, 31], strides = [1, 1]} : vector<18x32xf32> to vector<18x31xf32>
    %43 = tpu.concatenate %42, %39 in 1 : vector<18x31xf32>, vector<18x1xf32> -> vector<18x32xf32>
    %cst_14 = arith.constant 0.000000e+00 : f32
    %44 = vector.shape_cast %18 : vector<1x32xi1> to vector<1x32xi1>
    %45 = vector.broadcast %44 : vector<1x32xi1> to vector<18x32xi1>
    %46 = vector.broadcast %cst_14 : f32 to vector<18x32xf32>
    %47 = arith.select %45, %46, %41 : vector<18x32xi1>, vector<18x32xf32>
    %cst_15 = arith.constant 0.000000e+00 : f32
    %48 = vector.shape_cast %20 : vector<1x32xi1> to vector<1x32xi1>
    %49 = vector.broadcast %48 : vector<1x32xi1> to vector<18x32xi1>
    %50 = vector.broadcast %cst_15 : f32 to vector<18x32xf32>
    %51 = arith.select %49, %50, %43 : vector<18x32xi1>, vector<18x32xf32>
    %52 = tpu.concatenate %47, %38, %51 in 0 : vector<18x32xf32>, vector<18x32xf32>, vector<18x32xf32> -> vector<54x32xf32>
    %53 = arith.truncf %52 : vector<54x32xf32> to vector<54x32xbf16>
    %c0_16 = arith.constant 0 : index
    %c0_17 = arith.constant 0 : index
    %54 = vector.load %arg6[%c0_16, %c0_17] : memref<32x54xbf16, #tpu.memory_space<vmem>>, vector<32x54xbf16>
    %cst_18 = arith.constant dense<0.000000e+00> : vector<32x32xf32>
    %55 = tpu.matmul %54, %53, %cst_18 {dimension_numbers = #tpu.dot_dimension_numbers<[1], [0], [0], [1], [0, 0, 1, 1], [], []>} : vector<32x54xbf16>, vector<54x32xbf16>, vector<32x32xf32> -> vector<32x32xf32>
    %c0_19 = arith.constant 0 : index
    %c0_20 = arith.constant 0 : index
    %56 = vector.load %arg7[%c0_19, %c0_20] : memref<32x1xf32, #tpu.memory_space<vmem>>, vector<32x1xf32>
    %57 = vector.broadcast %56 : vector<32x1xf32> to vector<32x32xf32>
    %58 = arith.addf %55, %57 : vector<32x32xf32>
    %c0_21 = arith.constant 0 : index
    %c0_22 = arith.constant 0 : index
    %59 = vector.load %arg5[%c0_21, %c0_22] : memref<32x32xf32, #tpu.memory_space<vmem>>, vector<32x32xf32>
    %60 = arith.addf %58, %59 : vector<32x32xf32>
    %61 = arith.negf %60 : vector<32x32xf32>
    %62 = math.exp %61 : vector<32x32xf32>
    %cst_23 = arith.constant 1.000000e+00 : f32
    %63 = vector.broadcast %cst_23 : f32 to vector<32x32xf32>
    %64 = arith.addf %63, %62 : vector<32x32xf32>
    %65 = arith.divf %63, %64 : vector<32x32xf32>
    %66 = arith.mulf %60, %65 : vector<32x32xf32>
    %cst_24 = arith.constant 0.000000e+00 : f32
    %67 = vector.broadcast %cst_24 : f32 to vector<32x1xf32>
    %68 = vector.extract_strided_slice %66 {offsets = [0, 0], sizes = [32, 31], strides = [1, 1]} : vector<32x32xf32> to vector<32x31xf32>
    %69 = tpu.concatenate %67, %68 in 1 : vector<32x1xf32>, vector<32x31xf32> -> vector<32x32xf32>
    %70 = vector.extract_strided_slice %66 {offsets = [0, 1], sizes = [32, 31], strides = [1, 1]} : vector<32x32xf32> to vector<32x31xf32>
    %71 = tpu.concatenate %70, %67 in 1 : vector<32x31xf32>, vector<32x1xf32> -> vector<32x32xf32>
    %cst_25 = arith.constant 0.000000e+00 : f32
    %72 = vector.shape_cast %18 : vector<1x32xi1> to vector<1x32xi1>
    %73 = vector.broadcast %72 : vector<1x32xi1> to vector<32x32xi1>
    %74 = vector.broadcast %cst_25 : f32 to vector<32x32xf32>
    %75 = arith.select %73, %74, %69 : vector<32x32xi1>, vector<32x32xf32>
    %cst_26 = arith.constant 0.000000e+00 : f32
    %76 = vector.shape_cast %20 : vector<1x32xi1> to vector<1x32xi1>
    %77 = vector.broadcast %76 : vector<1x32xi1> to vector<32x32xi1>
    %78 = vector.broadcast %cst_26 : f32 to vector<32x32xf32>
    %79 = arith.select %77, %78, %71 : vector<32x32xi1>, vector<32x32xf32>
    %80 = tpu.concatenate %75, %66, %79 in 0 : vector<32x32xf32>, vector<32x32xf32>, vector<32x32xf32> -> vector<96x32xf32>
    %81 = arith.truncf %80 : vector<96x32xf32> to vector<96x32xbf16>
    %c0_27 = arith.constant 0 : index
    %c0_28 = arith.constant 0 : index
    %82 = vector.load %arg8[%c0_27, %c0_28] : memref<9x96xbf16, #tpu.memory_space<vmem>>, vector<9x96xbf16>
    %cst_29 = arith.constant dense<0.000000e+00> : vector<9x32xf32>
    %83 = tpu.matmul %82, %81, %cst_29 {dimension_numbers = #tpu.dot_dimension_numbers<[1], [0], [0], [1], [0, 0, 1, 1], [], []>} : vector<9x96xbf16>, vector<96x32xbf16>, vector<9x32xf32> -> vector<9x32xf32>
    %c0_30 = arith.constant 0 : index
    %c0_31 = arith.constant 0 : index
    %84 = vector.load %arg9[%c0_30, %c0_31] : memref<9x1xf32, #tpu.memory_space<vmem>>, vector<9x1xf32>
    %85 = vector.broadcast %84 : vector<9x1xf32> to vector<9x32xf32>
    %86 = arith.addf %83, %85 : vector<9x32xf32>
    %87 = arith.subf %86, %36 : vector<9x32xf32>
    %88 = arith.mulf %87, %87 : vector<9x32xf32>
    %89 = vector.shape_cast %88 : vector<9x32xf32> to vector<1x9x32xf32>
    %cst_32 = arith.constant dense<0.000000e+00> : vector<1xf32>
    %90 = vector.multi_reduction <add>, %89, %cst_32 [1, 2] : vector<1x9x32xf32> to vector<1xf32>
    %91 = vector.shape_cast %90 : vector<1xf32> to vector<1x1x1xf32>
    %92 = vector.extract %91[0, 0, 0] : f32 from vector<1x1x1xf32>
    %cst_33 = arith.constant 0.00347222225 : f32
    %93 = arith.mulf %92, %cst_33 : f32
    %c0_34 = arith.constant 0 : index
    %c0_35 = arith.constant 0 : index
    %94 = memref.load %arg10[%c0_34, %c0_35] : memref<1x1xf32, #tpu.memory_space<smem>>
    memref.store %93, %arg10[%c0_34, %c0_35] : memref<1x1xf32, #tpu.memory_space<smem>>
    return
  }
}

</mosaic_0001>

<bundles_post_ra>
// kernel: tpu_custom_call.1
= control target key start
LH: loop header
LB: loop body
LE: loop exit
PB: predicated region body
PF: predicated region fallthrough
CT: control target
= control target key end

     0   :  { %15 = vsyncpa [#allocation3], 0  ;;  %s1026_s0 = inlined_call_operand.vmem [shape: f32[1,32], index: 0, kind: input, shape index: {}]   ;;  %s1027_s1 = inlined_call_operand.hbm [shape: f32[1,32], index: 1, kind: input, shape index: {}]   ;;  %s1028_s2 = inlined_call_operand.vmem [shape: f32[9,32], index: 2, kind: input, shape index: {}]   ;;  %s1029_s3 = inlined_call_operand.hbm [shape: f32[9,32], index: 3, kind: input, shape index: {}]   ;;  %s1030_s4 = inlined_call_operand.hbm [shape: f32[9,32], index: 4, kind: input, shape index: {}]   ;;  %s1031_s5 = inlined_call_operand.vmem [shape: f32[32,32], index: 5, kind: input, shape index: {}]   ;;  %s1032_s6 = inlined_call_operand.hbm [shape: bf16[32,54], index: 6, kind: input, shape index: {}]   ;;  %s1033_s7 = inlined_call_operand.vmem [shape: f32[32,1], index: 7, kind: input, shape index: {}]   ;;  %s1034_s8 = inlined_call_operand.hbm [shape: bf16[9,96], index: 8, kind: input, shape index: {}]   ;;  %s1035_s9 = inlined_call_operand.vmem [shape: f32[9,1], index: 9, kind: input, shape index: {}]   ;;  %s1036_s10 = inlined_call_operand.hbm [shape: f32[1,1], index: 10, kind: output, shape index: {}]  }
   0x1   :  { %16 = vsyncpa [#allocation6], 0 }
   0x2   :  { %17 = vsyncpa [#allocation9], 0  ;;  %s38_s15 = sshll.u32 %s1029_s3, 4  ;;  %s39_s15 = int_to_ptr.hbm [resolvable:$true] %s38_s15 }
   0x3   :  { %18 = vsyncpa [#allocation4], 0  ;;  %s769_s16 = smov [#allocation5]   ;;  %s66_s20 = sshll.u32 %s1032_s6, 4  ;;  %s67_s20 = int_to_ptr.hbm [resolvable:$true] %s66_s20 }
   0x4   :  { %s40_s17 = sshll.u32 %s769_s16, 4  ;;  %s770_s21 = smov 128   ;;  %s41_s17 = int_to_ptr.vmem [resolvable:$true] %s40_s17 }
   0x5   :  { %s771_s22 = smov 8   ;;  %s772_s23 = smov [#allocation8]  }
   0x6   :  { %46 = dma.hbm_to_vmem [thread:$0]  %s39_s15, 256, %s41_s17, [#allocation6], %s770_s21, %s770_s21, %s771_s22  }
   0x7   :  { %s68_s24 = sshll.u32 %s772_s23, 4  ;;  %s773_s25 = smov 64   ;;  %s69_s24 = int_to_ptr.vmem [resolvable:$true] %s68_s24 }
   0x8   :  { %s774_s26 = smov 4   ;;  %s26_s28 = sshll.u32 %s1027_s1, 4  ;;  %s27_s28 = int_to_ptr.hbm [resolvable:$true] %s26_s28 }
   0x9   :  { %74 = dma.hbm_to_vmem [thread:$0]  %s67_s20, 256, %s69_s24, [#allocation9], %s773_s25, %s773_s25, %s774_s26  }
   0xa   :  { %s775_s29 = smov [#allocation2]   ;;  %s51_s12 = sshll.u32 %s1030_s4, 4  ;;  %s52_s12 = int_to_ptr.hbm [resolvable:$true] %s51_s12 }
   0xb   :  { %s28_s30 = sshll.u32 %s775_s29, 4  ;;  %s776_s13 = smov [#allocation7]   ;;  %s29_s30 = int_to_ptr.vmem [resolvable:$true] %s28_s30 }
   0xc   :  { %31 = dma.hbm_to_vmem [thread:$0]  %s27_s28, 16, %s29_s30, [#allocation3]  }
   0xd   :  { %s53_s14 = sshll.u32 %s776_s13, 4  ;;  %s81_s17 = sshll.u32 %s1034_s8, 4  ;;  %s54_s14 = int_to_ptr.vmem [resolvable:$true] %s53_s14  ;;  %s82_s17 = int_to_ptr.hbm [resolvable:$true] %s81_s17 }
   0xe   :  { %59 = dma.hbm_to_vmem [thread:$0]  %s52_s12, 256, %s54_s14, [#allocation6], %s770_s21, %s770_s21, %s771_s22  }
   0xf   :  { %s777_s1 = smov [#allocation10]  }
  0x10   :  { %s83_s18 = sshll.u32 %s777_s1, 4  ;;  %s84_s18 = int_to_ptr.vmem [resolvable:$true] %s83_s18 }
  0x11   :  { %89 = dma.hbm_to_vmem [thread:$0]  %s82_s17, 128, %s84_s18, [#allocation9], %s773_s25, %s773_s25, %s774_s26  }
  0x12   :  { %761 = dma.done.wait [#allocation3], 16  }
  0x13   :  { %762 = vsyncadd [#allocation3], 4294967280 }
  0x14   :  { %763 = dma.done.wait [#allocation6], 512  }
  0x15   :  { %764 = vsyncadd [#allocation6], 4294966784 }
  0x16   :  { %765 = dma.done.wait [#allocation9], 384  }
  0x17   :  { %766 = vsyncadd [#allocation9], 4294966912  ;;  %v132_v0 = vld [vmem:[%s1028_s2 + $0x8] sm:$0x1]  ;;  %v857_v2 = vld [vmem:[#allocation5 + $0x8] sm:$0x1]  ;;  %v113_v25 = vlaneseq }
  0x18   :  { %v855_v1 = vmul.f32 0.31830987, %v132_v0  ;;  %v862_v3 = vld [vmem:[%s1026_s0] ss:$0 sm:$0xff]  ;;  %v155_v5 = vld [vmem:[#allocation7] sm:$0xff]  ;;  %vm159_vm0 = vcmask 1040384  }
  0x19   :  { %v864_v4 = vld [vmem:[#allocation2] ss:$0 sm:$0xff]  ;;  %v156_v6 = vld [vmem:[#allocation7 + $0x8] sm:$0x1]  ;;  %v160_v8 = vrot.slane %v155_v5, 7  ;;  %v871_v11 = vld [vmem:[#allocation5] sm:$0xff] }
  0x1a   :  { %v141_v7 = vmul.f32 %v862_v3, %v855_v1  ;;  %v161_v9 = vrot.slane %v156_v6, 7  ;;  %v131_v10 = vld [vmem:[%s1028_s2] sm:$0xff]  ;;  %v146_v12 = vmul.f32 %v864_v4, %v857_v2  ;;  %v145_v14 = vmul.f32 %v864_v4, %v871_v11  ;;  %s778_s0 = smov 1   ;;  %s779_s2 = smov 127   ;;  %v235_v28 = vld [vmem:[%s1033_s7 + $0x8] sm:$0xff]  ;;  %v236_v30 = vld [vmem:[%s1033_s7 + $0x10] sm:$0xff] }
  0x1b   :  { %v875_v13 = vmul.f32 0.31830987, %v131_v10  ;;  %vm203_vm1 = vcmask 1041408   ;;  %v114_v26 = vand.u32 127, %v113_v25  ;;  %v234_v27 = vld [vmem:[%s1033_s7] sm:$0xff]  ;;  %v780_v29 = vmov 0  }
  0x1c   :  { %v162_v15 = vsel %vm159_vm0, %v160_v8, %v161_v9  ;;  %v148_v16 = vadd.f32 %v146_v12, %v141_v7  ;;  %589 = vset.pattern.permute.xlu0 %v780_v29  ;;  %590 = vset.pattern.permute.xlu1 %v780_v29  ;;  %vm189_vm2 = vcmask 252928   ;;  %vm215_vm4 = vcmask 1043456   ;;  %v237_v41 = vld [vmem:[%s1033_s7 + $0x18] sm:$0xff]  ;;  %v557_v9 = vld [vmem:[#allocation8 + $0x8] sm:$0xff]  ;;  %s499_s4 = sshll.u32 %s1036_s10, 4  ;;  %s781_s20 = smov [#allocation11]   ;;  %s500_s4 = int_to_ptr.hbm [resolvable:$true] %s499_s4 }
  0x1d   :  { %v140_v17 = vmul.f32 %v862_v3, %v875_v13  ;;  %171 = vrot.lane.b32.xlu1 %v162_v15, %s778_s0  ;;  %v207_v22 = vrot.slane %v162_v15, 6  ;;  %v119_v31 = vand.u32 15, %v114_v26  ;;  %588 = vset.pattern.permute.xlu2 %v780_v29  ;;  %vm176_vm5 = vcmask 7168  }
  0x1e   :  { %v882_v18 = vsel %vm159_vm0, %v148_v16, %v160_v8  ;;  %250 = vperm.xlu2 %588, %v236_v30   ;;  %vm275_vm6 = vcmask 1042432   ;;  %v556_v8 = vld [vmem:[#allocation8] sm:$0xff]  ;;  %vm268_vm10 = vcmask 441344  }
  0x1f   :  { %v884_v19 = vadd.f32 %v145_v14, %v140_v17  ;;  %v578_v20 = vpack.i.bf16 %v162_v15, %v882_v18  ;;  %v205_v23 = vrot.slane %v882_v18, 6  ;;  %vm904_vm3 = vcmp.eq.s32.totalorder %v119_v31, 15  ;;  %v298_v14 = vld [vmem:[%s1031_s5] sm:$0xff] }
  0x20   :  { %vm919_vm7 = vcmp.eq.s32.totalorder %v119_v31, 0 }
  0x21   :  { %v583_v21 = vpack.i.bf16 %v882_v18, %v884_v19  ;;  %579 = vrot.lane.b32.xlu0 %v578_v20, %s779_s2  ;;  %v208_v24 = vsel %vm203_vm1, %v205_v23, %v207_v22  ;;  %v204_v54 = vrot.slane %v884_v19, 6  ;;  %vm520_vm8 = vmneg %vm919_vm7  ;;  %v300_v20 = vld [vmem:[%s1031_s5 + $0x10] sm:$0xff] }
  0x22   :  { %vm937_vm9 = vmpackc.low %vm520_vm8, %vm520_vm8 }
  0x23   :  { %v206_v61 = vsel %vm203_vm1, %v204_v54, %v205_v23 }
  0x25   :  { %584 = vrot.lane.b32.xlu1 %v583_v21, %s778_s0 }
  0x26   :  { %255 = vperm.xlu2 %588, %v237_v41  }
  0x29   :  { %180 = vrot.lane.b32.xlu0 %v884_v19, %s779_s2 }
  0x2d   :  { %245 = vperm.xlu1 %590, %v235_v28  }
  0x31   :  { %240 = vperm.xlu0 %589, %v234_v27  }
  0x78   :  { %v251_v16 = vpop.permute.xlu2 %250 }
  0x80   :  { %v256_v29 = vpop.permute.xlu2 %255 }
  0x8f   :  { %v172_v33 = vpop.permute.xlu1 %171 }
  0x90   :  { %v179_v49 = vsel %vm176_vm5, 0.0, %v172_v33 }
  0x91   :  { %v197_v55 = vsel %vm919_vm7, 0.0, %v179_v49 }
  0x92   :  { %v224_v62 = vsel %vm203_vm1, %v197_v55, %v204_v54 }
  0x93   :  { %v580_v32 = vpop.permute.xlu0 %579  ;;  %v227_v5 = vpack.c.bf16 %v206_v61, %v224_v62 }
  0x94   :  { %v582_v35 = vunpack.i.h.bf16 %v580_v32  ;;  %v581_v36 = vunpack.i.l.bf16 %v580_v32 }
  0x96   :  { %v192_v37 = vsel %vm189_vm2, %v582_v35, 0.0  ;;  %v191_v38 = vsel %vm189_vm2, %v581_v36, 0.0  ;;  %v301_v35 = vld [vmem:[%s1031_s5 + $0x18] sm:$0xff] }
  0x97   :  { %v202_v39 = vsel %vm904_vm3, 0.0, %v192_v37  ;;  %v201_v40 = vsel %vm904_vm3, 0.0, %v191_v38  ;;  %v585_v52 = vpop.permute.xlu1 %584 }
  0x98   :  { %v219_v42 = vrot.slane %v202_v39, 4  ;;  %v217_v43 = vrot.slane %v201_v40, 4  ;;  %v587_v58 = vunpack.i.h.bf16 %v585_v52  ;;  %v586_v59 = vunpack.i.l.bf16 %v585_v52 }
  0x9a   :  { %v220_v44 = vsel %vm215_vm4, %v217_v43, %v219_v42  ;;  %v178_v63 = vsel %vm176_vm5, 0.0, %v587_v58  ;;  %v177_v0 = vsel %vm176_vm5, 0.0, %v586_v59 }
  0x9b   :  { %v181_v45 = vpop.permute.xlu0 %180  ;;  %v229_v46 = vpack.c.bf16 %v220_v44, %v220_v44  ;;  %v523_v6 = vpack.c.bf16 %v178_v63, %v177_v0 }
  0x9c   :  { %v190_v47 = vsel %vm189_vm2, %v181_v45, 0.0 }
  0x9d   :  { %v200_v50 = vsel %vm904_vm3, 0.0, %v190_v47  ;;  %v277_v51 = vsel %vm275_vm6, %v229_v46, 0 }
  0x9e   :  { %v216_v53 = vrot.slane %v200_v50, 4  ;;  %283 = vmatpush.bf16.msra.mxu0 %v277_v51  ;;  %559 = vmatpush.bf16.msra.mxu2 %v277_v51 }
  0x9f   :  { %v246_v21 = vpop.permute.xlu1 %245 }
  0xa0   :  { %v218_v56 = vsel %vm215_vm4, %v216_v53, %v217_v43  ;;  %v225_v57 = vsel %vm215_vm4, %v208_v24, %v216_v53  ;;  %v299_v24 = vld [vmem:[%s1031_s5 + $0x8] sm:$0xff] }
  0xa1   :  { %v228_v60 = vpack.c.bf16 %v218_v56, %v225_v57 }
  0xa3   :  { %284 = vmatpush.bf16.msra.mxu0 %v228_v60  ;;  %560 = vmatpush.bf16.msra.mxu2 %v228_v60  ;;  %v241_v10 = vpop.permute.xlu0 %240 }
  0xa7   :  { %285 = vmatpush.bf16.msra.mxu0 %v227_v5  ;;  %561 = vmatpush.bf16.msra.mxu2 %v227_v5 }
  0xab   :  { %524 = vmatpush.bf16.msk.msra.mxu0 %vm937_vm9, %v523_v6  ;;  %562 = vmatpush.bf16.msk.msra.mxu2 %vm937_vm9, %v523_v6 }
  0xae   :  { %525 = vmatmul.msk.bf16.vlgmr.msra.gmra.mxu0 %vm268_vm10, %v556_v8  ;;  %526 = vmatmul.msk.bf16.vlgmr.msra.gmra.mxu2 %vm268_vm10, %v557_v9 }
 0x12b   :  { %v288_v12 = vpop.f32.mrf.mxu0 }
 0x12c   :  { %v289_v15 = vadd.f32 %v288_v12, %v241_v10 }
 0x12e   :  { %v948_v17 = vadd.f32 %v298_v14, %v289_v15 }
 0x130   :  { %v527_v18 = vmul.f32 -1.442695, %v948_v17 }
 0x131   :  { %v293_v19 = vpop.f32.mrf.mxu2 }
 0x132   :  { %613 = vpow2.f32 %v527_v18  ;;  %v294_v22 = vadd.f32 %v293_v19, %v251_v16 }
 0x133   :  { %v290_v23 = vpop.f32.mrf.mxu0 }
 0x134   :  { %v957_v25 = vadd.f32 %v300_v20, %v294_v22  ;;  %v291_v26 = vadd.f32 %v290_v23, %v246_v21 }
 0x136   :  { %v529_v27 = vmul.f32 -1.442695, %v957_v25  ;;  %v960_v28 = vadd.f32 %v299_v24, %v291_v26 }
 0x138   :  { %v614_v30 = vpop.eup %613  ;;  %615 = vpow2.f32 %v529_v27  ;;  %v528_v31 = vmul.f32 -1.442695, %v960_v28 }
 0x139   :  { %v318_v32 = vadd.f32 1.0, %v614_v30  ;;  %v295_v33 = vpop.f32.mrf.mxu2 }
 0x13a   :  { %617 = vpow2.f32 %v528_v31  ;;  %v296_v36 = vadd.f32 %v295_v33, %v256_v29 }
 0x13b   :  { %619 = vrcp.f32 %v318_v32  ;;  %v331_v55 = vand.u32 2147483647, %v318_v32  ;;  %v333_v56 = vand.u32 2147483648, %v318_v32  ;;  %vm327_vm12 = vweird.f32 %v318_v32 }
 0x13c   :  { %v966_v37 = vadd.f32 %v301_v35, %v296_v36 }
 0x13d   :  { %vm332_vm1 = vcmp.eq.f32.partialorder %v331_v55, 8.507059e+37  ;;  %v334_v8 = vor.u32 1.1754944e-38, %v333_v56 }
 0x13e   :  { %v616_v38 = vpop.eup %615  ;;  %v530_v39 = vmul.f32 -1.442695, %v966_v37 }
 0x13f   :  { %v320_v40 = vadd.f32 1.0, %v616_v38 }
 0x140   :  { %v618_v41 = vpop.eup %617  ;;  %621 = vpow2.f32 %v530_v39 }
 0x141   :  { %v620_v42 = vpop.eup %619  ;;  %623 = vrcp.f32 %v320_v40  ;;  %v319_v44 = vadd.f32 1.0, %v618_v41  ;;  %v361_v58 = vand.u32 2147483647, %v320_v40  ;;  %v363_v59 = vand.u32 2147483648, %v320_v40 }
 0x142   :  { %v323_v43 = vmul.f32 %v620_v42, %v318_v32  ;;  %vm328_vm11 = vweird.f32 %v620_v42  ;;  %vm357_vm14 = vweird.f32 %v320_v40 }
 0x143   :  { %625 = vrcp.f32 %v319_v44  ;;  %vm969_vm13 = vmor %vm327_vm12, %vm328_vm11  ;;  %v348_v62 = vand.u32 2147483648, %v319_v44  ;;  %v346_v6 = vand.u32 2147483647, %v319_v44  ;;  %vm979_vm6 = vcmp.eq.f32.partialorder %v361_v58, 8.507059e+37 }
 0x144   :  { %v324_v45 = vsub.f32 1.0, %v323_v43  ;;  %v364_v15 = vor.u32 1.1754944e-38, %v363_v59  ;;  %vm342_vm7 = vweird.f32 %v319_v44  ;;  %v439_v43 = vld [vmem:[%s1035_s9 + $0x8] sm:$0x1] }
 0x145   :  { %v349_v19 = vor.u32 1.1754944e-38, %v348_v62  ;;  %vm347_vm10 = vcmp.eq.f32.partialorder %v346_v6, 8.507059e+37 }
 0x146   :  { %v622_v46 = vpop.eup %621  ;;  %v325_v48 = vmul.f32 %v620_v42, %v324_v45 }
 0x147   :  { %v624_v47 = vpop.eup %623  ;;  %v321_v49 = vadd.f32 1.0, %v622_v46 }
 0x148   :  { %v353_v50 = vmul.f32 %v624_v47, %v320_v40  ;;  %v326_v53 = vadd.f32 %v620_v42, %v325_v48  ;;  %vm358_vm15 = vweird.f32 %v624_v47 }
 0x149   :  { %627 = vrcp.f32 %v321_v49  ;;  %v626_v51 = vpop.eup %625  ;;  %vm975_vm4 = vmor %vm357_vm14, %vm358_vm15  ;;  %v378_v21 = vand.u32 2147483648, %v321_v49  ;;  %vm372_vm11 = vweird.f32 %v321_v49  ;;  %v376_v23 = vand.u32 2147483647, %v321_v49 }
 0x14a   :  { %v354_v52 = vsub.f32 1.0, %v353_v50  ;;  %v338_v54 = vmul.f32 %v626_v51, %v319_v44  ;;  %v330_v0 = vsel %vm969_vm13, %v620_v42, %v326_v53  ;;  %vm343_vm0 = vweird.f32 %v626_v51  ;;  %v438_v42 = vld [vmem:[%s1035_s9] sm:$0xff]  ;;  %vm535_vm15 = vmneg %vm904_vm3 }
 0x14b   :  { %v335_v18 = vsel %vm332_vm1, %v334_v8, %v330_v0  ;;  %vm344_vm8 = vmor %vm342_vm7, %vm343_vm0  ;;  %v379_v32 = vor.u32 1.1754944e-38, %v378_v21  ;;  %vm377_vm14 = vcmp.eq.f32.partialorder %v376_v23, 8.507059e+37  ;;  %v533_v0 = vld [vmem:[#allocation10] sm:$0xf]  ;;  %vm477_vm3 = vcmask 261120  }
 0x14c   :  { %v355_v57 = vmul.f32 %v624_v47, %v354_v52  ;;  %v339_v60 = vsub.f32 1.0, %v338_v54  ;;  %v382_v29 = vmul.f32 %v335_v18, %v948_v17  ;;  %vm537_vm0 = vmpackc.low %vm535_vm15, %vm535_vm15  ;;  %v150_v18 = vmul.f32 %v862_v3, %v857_v2 }
 0x14e   :  { %v340_v5 = vmul.f32 %v626_v51, %v339_v60  ;;  %v356_v9 = vadd.f32 %v624_v47, %v355_v57 }
 0x14f   :  { %v628_v63 = vpop.eup %627 }
 0x150   :  { %v368_v10 = vmul.f32 %v628_v63, %v321_v49  ;;  %v341_v16 = vadd.f32 %v626_v51, %v340_v5  ;;  %v360_v24 = vsel %vm975_vm4, %v624_v47, %v356_v9  ;;  %vm373_vm12 = vweird.f32 %v628_v63  ;;  %v558_v5 = vld [vmem:[#allocation10] sm:$0x10] }
 0x151   :  { %v365_v33 = vsel %vm979_vm6, %v364_v15, %v360_v24  ;;  %vm374_vm13 = vmor %vm372_vm11, %vm373_vm12  ;;  %v534_v8 = vor.u32 %v558_v5, %v533_v0  ;;  %v149_v9 = vmul.f32 %v862_v3, %v871_v11 }
 0x152   :  { %v369_v20 = vsub.f32 1.0, %v368_v10  ;;  %v345_v22 = vsel %vm344_vm8, %v626_v51, %v341_v16  ;;  %v384_v40 = vmul.f32 %v365_v33, %v957_v25  ;;  %v151_v10 = vmul.f32 %v864_v4, %v875_v13 }
 0x153   :  { %v350_v26 = vsel %vm347_vm10, %v349_v19, %v345_v22  ;;  %v152_v19 = vmul.f32 %v864_v4, %v855_v1 }
 0x154   :  { %v370_v27 = vmul.f32 %v628_v63, %v369_v20  ;;  %v383_v30 = vmul.f32 %v350_v26, %v960_v28  ;;  %v153_v15 = vsub.f32 %v149_v9, %v151_v10 }
 0x155   :  { %v154_v20 = vsub.f32 %v150_v18, %v152_v19 }
 0x156   :  { %v371_v31 = vadd.f32 %v628_v63, %v370_v27  ;;  %v606_v35 = vpack.i.bf16 %v383_v30, %v382_v29  ;;  %v432_v36 = vpack.c.bf16 %v383_v30, %v382_v29 }
 0x158   :  { %v375_v38 = vsel %vm374_vm13, %v628_v63, %v371_v31  ;;  %607 = vrot.lane.b32.xlu0 %v606_v35, %s778_s0  ;;  %597 = vrot.lane.b32.xlu1 %v606_v35, %s779_s2 }
 0x159   :  { %v380_v39 = vsel %vm377_vm14, %v379_v32, %v375_v38 }
 0x15a   :  { %v385_v17 = vmul.f32 %v380_v39, %v966_v37 }
 0x15c   :  { %v591_v28 = vpack.i.bf16 %v385_v17, %v384_v40  ;;  %v433_v41 = vpack.c.bf16 %v385_v17, %v384_v40 }
 0x15e   :  { %592 = vrot.lane.b32.xlu2 %v591_v28, %s779_s2 }
 0x160   :  { %442 = vperm.xlu1 %590, %v438_v42  }
 0x166   :  { %602 = vrot.lane.b32.xlu2 %v591_v28, %s778_s0 }
 0x16e   :  { %447 = vperm.xlu2 %588, %v439_v43  }
 0x1b8   :  { %v593_v44 = vpop.permute.xlu2 %592 }
 0x1b9   :  { %v595_v25 = vunpack.i.h.bf16 %v593_v44  ;;  %v594_v37 = vunpack.i.l.bf16 %v593_v44 }
 0x1bb   :  { %v420_v45 = vsel %vm189_vm2, %v594_v37, 0.0  ;;  %v421_v46 = vsel %vm189_vm2, %v595_v25, 0.0 }
 0x1bc   :  { %v538_v47 = vpack.c.bf16 %v421_v46, %v420_v45 }
 0x1be   :  { %539 = vmatpush.bf16.msk.msra.mxu1 %vm537_vm0, %v538_v47 }
 0x1c0   :  { %v603_v54 = vpop.permute.xlu2 %602 }
 0x1c1   :  { %v605_v34 = vunpack.i.h.bf16 %v603_v54  ;;  %v604_v55 = vunpack.i.l.bf16 %v603_v54 }
 0x1c3   :  { %v405_v57 = vsel %vm176_vm5, 0.0, %v605_v34  ;;  %v404_v58 = vsel %vm176_vm5, 0.0, %v604_v55 }
 0x1c4   :  { %v548_v61 = vpack.c.bf16 %v405_v57, %v404_v58 }
 0x1c8   :  { %v448_v21 = vpop.permute.xlu2 %447 }
 0x1ca   :  { %v598_v48 = vpop.permute.xlu1 %597  ;;  %v608_v56 = vpop.permute.xlu0 %607 }
 0x1cb   :  { %v600_v49 = vunpack.i.h.bf16 %v598_v48  ;;  %v599_v50 = vunpack.i.l.bf16 %v598_v48  ;;  %v610_v59 = vunpack.i.h.bf16 %v608_v56  ;;  %v609_v60 = vunpack.i.l.bf16 %v608_v56 }
 0x1cd   :  { %v419_v51 = vsel %vm189_vm2, %v600_v49, 0.0  ;;  %v418_v52 = vsel %vm189_vm2, %v599_v50, 0.0  ;;  %v403_v62 = vsel %vm176_vm5, 0.0, %v610_v59  ;;  %v402_v63 = vsel %vm176_vm5, 0.0, %v609_v60 }
 0x1ce   :  { %v543_v53 = vpack.c.bf16 %v419_v51, %v418_v52  ;;  %v553_v6 = vpack.c.bf16 %v403_v62, %v402_v63  ;;  %vm455_vm2 = vcmask 785408   ;;  %vm479_vm5 = vcmask 253952  }
 0x1d0   :  { %544 = vmatpush.bf16.msk.msra.mxu1 %vm537_vm0, %v543_v53 }
 0x1d2   :  { %v443_v14 = vpop.permute.xlu1 %442 }
 0x1d4   :  { %463 = vmatpush.bf16.msra.mxu1 %v433_v41 }
 0x1d8   :  { %464 = vmatpush.bf16.msra.mxu1 %v432_v36 }
 0x1dc   :  { %549 = vmatpush.bf16.msk.msra.mxu1 %vm937_vm9, %v548_v61 }
 0x1e0   :  { %554 = vmatpush.bf16.msk.msra.mxu1 %vm937_vm9, %v553_v6 }
 0x1e3   :  { %555 = vmatmul.msk.bf16.vlgmr.msra.gmra.mxu1 %vm455_vm2, %v534_v8 }
 0x260   :  { %v468_v12 = vpop.f32.mrf.mxu1 }
 0x261   :  { %v469_v16 = vadd.f32 %v468_v12, %v443_v14 }
 0x263   :  { %v473_v7 = vsub.f32 %v469_v16, %v153_v15 }
 0x265   :  { %v475_v24 = vmul.f32 %v473_v7, %v473_v7 }
 0x267   :  { %v478_v26 = vsel %vm477_vm3, %v475_v24, 0.0 }
 0x268   :  { %v470_v22 = vpop.f32.mrf.mxu1 }
 0x269   :  { %v471_v23 = vadd.f32 %v470_v22, %v448_v21 }
 0x26b   :  { %v474_v11 = vsub.f32 %v471_v23, %v154_v20 }
 0x26d   :  { %v476_v13 = vmul.f32 %v474_v11, %v474_v11 }
 0x26f   :  { %v480_v27 = vsel %vm479_vm5, %v476_v13, 0.0 }
 0x270   :  { %v481_v29 = vadd.f32 %v480_v27, %v478_v26 }
 0x272   :  { %482 = vadd.xlane.f32.xlu0 %v481_v29 }
 0x2e5   :  { %v483_v30 = vpop.xlane.xlu0 %482 }
 0x2e6   :  { %v484_v31 = vrot.slane %v483_v30, 4 }
 0x2e8   :  { %v485_v2 = vadd.f32 %v484_v31, %v483_v30 }
 0x2ea   :  { %v486_v3 = vrot.slane %v485_v2, 2 }
 0x2ec   :  { %v487_v32 = vadd.f32 %v486_v3, %v485_v2 }
 0x2ee   :  { %v488_v1 = vrot.slane %v487_v32, 1 }
 0x2f0   :  { %v489_v4 = vadd.f32 %v488_v1, %v487_v32 }
 0x2f2   :  { %563 = vpush %v489_v4 }
 0x323   :  { %s564_s19 = spop %563 }
 0x324   :  { %s491_s8 = smul.f32 0.0034722222, %s564_s19 }
 0x326   :  { %493 = sst [smem:[#allocation11]] %s491_s8 }
 0x327   :  { %502 = dma.smem_to_hbm %s781_s20, 16, %s500_s4, [#allocation4]  }
 0x328   :  { %767 = dma.done.wait [#allocation4], 16  }
 0x329   :  { %768 = vsyncadd [#allocation4], 4294967280 }
 0x32a   :  { %507 = sfence }
 0x32b   :  { %508 = vsyncpa [#allocation3], 1 }
 0x32c   :  { %509 = vsyncpa [#allocation6], 1 }
 0x32d   :  { %510 = vsyncpa [#allocation9], 1 }
 0x32e   :  { %511 = vsyncpa [#allocation4], 1 }

</bundles_post_ra>
